<compile_context>
chip_gen: v6e
topology: v6e:2x2x1
jax: 0.10.0
libtpu: 0.0.40
codegen_flags: <defaults>
</compile_context>

<pallas_src>
import functools
import math

import jax
import jax.numpy as jnp
from jax.experimental import pallas as pl
from jax.experimental.pallas import tpu as pltpu


def resnet_st_kernel(
    x_ref,                       # (dim, TILE_N)  -- batch on lanes
    w1_ref, b1_ref,              # (m, dim), (m, 1)
    w2_ref, b2_ref,              # (m, m),  (m, 1)
    w3_ref, b3_ref,
    w4_ref, b4_ref,
    w5_ref, b5_ref,
    w6_ref, b6_ref,
    woutT_ref,                   # (1, m)
    out_ref,                     # (1, TILE_N)
    *,
    act_dtype=jnp.float32,
):
    m = b1_ref.shape[0]
    t = x_ref.shape[1]

    x = x_ref[...]
    x0 = x[0:1, :]               # (1, T)
    x1 = x[1:2, :]               # (1, T)

    def linear(act, w_ref, b_ref):
        # (m, m) @ (m, T) -> (m, T); T-wide RHS keeps the MXU columns full.
        return (
            jnp.dot(w_ref[...], act.astype(jnp.float32),
                    preferred_element_type=jnp.float32)
            + b_ref[...]
        )

    def st(v):
        # torch.where(x >= 0, |x - 2*floor((x+1)/2)|, x / (1 + |x|))
        v = v.astype(act_dtype)
        av = jnp.abs(v)
        pos = jnp.abs(v - 2.0 * jnp.floor((v + 1.0) * 0.5))
        denom = 1.0 + av
        # Approx reciprocal on the (otherwise idle) EUP slot + one Newton step
        # on the VPU -> essentially exact 1/denom without a divide.
        inv = pl.reciprocal(denom, approx=True)
        inv = inv * (2.0 - denom * inv)
        neg = v * inv
        return jnp.where(v >= 0.0, pos, neg)

    # Shortcut s = x @ Ix for the hard-coded dim=2 selector: rows 0,1 of s are
    # x's two coordinates, the rest are zero.  Pure VPU, no matmul.
    row = jax.lax.broadcasted_iota(jnp.int32, (m, t), 0)
    s = jnp.where(row == 0, x0, jnp.where(row == 1, x1, 0.0)).astype(act_dtype)

    # fc1 (K = dim = 2): two broadcast FMAs on the VPU instead of an MXU matmul.
    w1 = w1_ref[...]
    y = st(w1[:, 0:1] * x0 + w1[:, 1:2] * x1 + b1_ref[...])

    # Block 1
    y = st(linear(y, w2_ref, b2_ref)) + s
    s = y
    # Block 2
    y = st(linear(y, w3_ref, b3_ref))
    y = st(linear(y, w4_ref, b4_ref)) + s
    s = y
    # Block 3
    y = st(linear(y, w5_ref, b5_ref))
    y = st(linear(y, w6_ref, b6_ref)) + s

    # outlayer (no bias): (1, m) @ (m, T) on the ~idle MXU (frees VALU/XLU
    # slots, which are the binding resource), lane-dense (1, T) store.
    out_ref[...] = jnp.dot(woutT_ref[...], y.astype(jnp.float32),
                           preferred_element_type=jnp.float32)


def _choose_tile_n(n, tile_n=None, target=2048):
    """Pick the lane-tile width.

    * sized relative to N so small batches aren't padded onto dead lanes,
    * capped at `target` (big enough that the ~0.35 us per-grid-step overhead
      is a small fraction of the VPU work per tile),
    * kept to >= 2 grid steps when the batch allows it so the single
      "parallel" grid axis can shard across v7x's two TensorCores.
    """
    if tile_n is not None:
        return tile_n
    n_r = pl.cdiv(n, 128) * 128
    num_tiles = pl.cdiv(n_r, min(target, n_r))
    if num_tiles < 2 and n_r >= 256:
        num_tiles = 2
    tile = pl.cdiv(pl.cdiv(n_r, num_tiles), 128) * 128
    return max(tile, 128)


def init_params(key, m, dim=2):
    """PyTorch nn.Linear-style init, weights kept in (out_features, in_features)
    layout (matches the transposed, batch-on-lanes kernel) and biases as
    (out_features, 1) columns."""
    params = {}
    keys = jax.random.split(key, 13)
    fan_ins = [dim, m, m, m, m, m]
    for i, fin in enumerate(fan_ins, start=1):
        bound = 1.0 / math.sqrt(fin)
        params[f"w{i}"] = jax.random.uniform(
            keys[2 * (i - 1)], (m, fin), jnp.float32, -bound, bound
        )
        params[f"b{i}"] = jax.random.uniform(
            keys[2 * (i - 1) + 1], (m, 1), jnp.float32, -bound, bound
        )
    bound = 1.0 / math.sqrt(m)
    params["wout"] = jax.random.uniform(keys[12], (m, 1), jnp.float32, -bound, bound)
    return params


@functools.partial(
    jax.jit, static_argnames=("boundary_control_type", "tile_n", "act_dtype")
)
def resnet_st_forward(x, params, boundary_control_type="none", tile_n=None,
                      act_dtype=jnp.float32):
    n, dim = x.shape
    m = params["b1"].shape[0]
    assert dim == 2, "ResNet_ST hard-codes the Ix shortcut for dim=2"

    tile = _choose_tile_n(n, tile_n)
    n_pad = pl.cdiv(n, tile) * tile
    num_tiles = n_pad // tile

    # Batch-on-lanes layout; zero-pad the batch to a multiple of the tile.
    # (Padding is at most tile-1 lanes now that the tile is sized from N.)
    x_t = jnp.zeros((dim, n_pad), jnp.float32).at[:, :n].set(x.T.astype(jnp.float32))

    resident = lambda shape: pl.BlockSpec(shape, lambda i: (0, 0))
    in_specs = [pl.BlockSpec((dim, tile), lambda i: (0, i))]        # x tile
    in_specs += [resident((m, dim)), resident((m, 1))]              # fc1
    for _ in range(5):                                              # fc2..fc6
        in_specs += [resident((m, m)), resident((m, 1))]
    in_specs += [resident((1, m))]                                  # wout^T

    flops = 2 * n_pad * (5 * m * m + 2 * m + m)
    transcendentals = 6 * n_pad * m
    bytes_accessed = 4 * (dim * n_pad + n_pad + 5 * m * m + m * dim + 7 * m)

    y_pad = pl.pallas_call(
        functools.partial(resnet_st_kernel, act_dtype=act_dtype),
        out_shape=jax.ShapeDtypeStruct((1, n_pad), jnp.float32),
        grid_spec=pl.GridSpec(
            grid=(num_tiles,),
            in_specs=in_specs,
            out_specs=pl.BlockSpec((1, tile), lambda i: (0, i)),
        ),
        compiler_params=pltpu.CompilerParams(
            dimension_semantics=("parallel",),
        ),
        cost_estimate=pl.CostEstimate(
            flops=flops,
            transcendentals=transcendentals,
            bytes_accessed=bytes_accessed,
        ),
    )(
        x_t,
        params["w1"], params["b1"], params["w2"], params["b2"],
        params["w3"], params["b3"], params["w4"], params["b4"],
        params["w5"], params["b5"], params["w6"], params["b6"],
        params["wout"].T,
    )
    y = y_pad[0, :n]  # (N,)

    # Boundary-control post-processing (glue, plain JAX).
    if boundary_control_type == "none":
        return y
    elif boundary_control_type == "net_u":
        x1c = x[:, 0]
        x2c = x[:, 1]
        r = (x1c ** 2 + x2c ** 2) ** 1 / 2  # matches PyTorch's `** 1 / 2` (i.e. /2, not sqrt)
        base = jnp.where(x1c > -0.5, 0.0, 1.0)
        return (jnp.pi / 2 - jnp.arctan(-x1c / x2c)) * jnp.sin(jnp.pi / 2 * r) * y + base
    elif boundary_control_type == "net_v":
        x1c = x[:, 0]
        x2c = x[:, 1]
        return (-jnp.pi / 2 - jnp.arctan(-x1c / x2c)) * y
    else:
        # TODO(synk): the original 'cube' branch falls through and returns None
        # in PyTorch; we return the raw network output instead.
        return y[:, None]


def _reference_forward(x, params):
    """Pure-JAX reference of the same math (PyTorch-layout weights)."""
    def st(v):
        return jnp.where(v >= 0, jnp.abs(v - 2 * jnp.floor((v + 1) / 2)),
                         v / (1 + jnp.abs(v)))

    n, dim = x.shape
    m = params["b1"].shape[0]
    ix = jnp.zeros((dim, m), jnp.float32).at[0, 0].set(1.0).at[1, 1].set(1.0)

    s = x @ ix
    y = st(x @ params["w1"].T + params["b1"].T)
    y = st(y @ params["w2"].T + params["b2"].T) + s
    s = y
    y = st(y @ params["w3"].T + params["b3"].T)
    y = st(y @ params["w4"].T + params["b4"].T) + s
    s = y
    y = st(y @ params["w5"].T + params["b5"].T)
    y = st(y @ params["w6"].T + params["b6"].T) + s
    return (y @ params["wout"])[:, 0]


if __name__ == "__main__":
    key = jax.random.PRNGKey(0)
    k_param, k0, k1, k2 = jax.random.split(key, 4)

    m = 32    # hidden width
    dim = 2   # input dim (module hard-codes Ix for dim=2)

    params = init_params(k_param, m, dim)

    # n=8    : single 128-lane tile (no over-padding for tiny batches)
    # n=1024 : forces >=2 grid steps (v7x megacore floor), tile = 512
    # n=2500 : multi-tile with a ragged, zero-padded last block
    for n, kx in ((8, k0), (1024, k1), (2500, k2)):
        x = jax.random.uniform(kx, (n, dim), jnp.float32, -1.0, 1.0)
        out = jax.block_until_ready(
            resnet_st_forward(x, params, boundary_control_type="none")
        )
        ref = _reference_forward(x, params)
        assert out.shape == (n,)
        assert jnp.allclose(out, ref, atol=1e-4, rtol=1e-4), (
            f"mismatch at n={n}: max abs err = {float(jnp.max(jnp.abs(out - ref)))}"
        )

    print("KERNEL_OK")
</pallas_src>

<mosaic_0001>
module attributes {stable_mosaic.version = 11 : i64} {
  func.func @resnet_st_kernel(%arg0: i32, %arg1: memref<2x128xf32, #tpu.memory_space<vmem>>, %arg2: memref<32x2xf32, #tpu.memory_space<vmem>>, %arg3: memref<32x1xf32, #tpu.memory_space<vmem>>, %arg4: memref<32x32xf32, #tpu.memory_space<vmem>>, %arg5: memref<32x1xf32, #tpu.memory_space<vmem>>, %arg6: memref<32x32xf32, #tpu.memory_space<vmem>>, %arg7: memref<32x1xf32, #tpu.memory_space<vmem>>, %arg8: memref<32x32xf32, #tpu.memory_space<vmem>>, %arg9: memref<32x1xf32, #tpu.memory_space<vmem>>, %arg10: memref<32x32xf32, #tpu.memory_space<vmem>>, %arg11: memref<32x1xf32, #tpu.memory_space<vmem>>, %arg12: memref<32x32xf32, #tpu.memory_space<vmem>>, %arg13: memref<32x1xf32, #tpu.memory_space<vmem>>, %arg14: memref<1x32xf32, #tpu.memory_space<vmem>>, %arg15: memref<1x128xf32, #tpu.memory_space<vmem>>) attributes {dimension_semantics = [#tpu.dimension_semantics<parallel>], iteration_bounds = array<i64: 1>, scalar_prefetch = 0 : i64, scratch_operands = 0 : i64, tpu.core_type = #tpu.core_type<tc>, window_params = [{transform_indices = @transform_0, window_bounds = array<i64: 2, 128>}, {pipeline_mode = #tpu.pipeline_mode<synchronous>, transform_indices = @transform_1, window_bounds = array<i64: 32, 2>}, {pipeline_mode = #tpu.pipeline_mode<synchronous>, transform_indices = @transform_2, window_bounds = array<i64: 32, 1>}, {pipeline_mode = #tpu.pipeline_mode<synchronous>, transform_indices = @transform_3, window_bounds = array<i64: 32, 32>}, {pipeline_mode = #tpu.pipeline_mode<synchronous>, transform_indices = @transform_4, window_bounds = array<i64: 32, 1>}, {pipeline_mode = #tpu.pipeline_mode<synchronous>, transform_indices = @transform_5, window_bounds = array<i64: 32, 32>}, {pipeline_mode = #tpu.pipeline_mode<synchronous>, transform_indices = @transform_6, window_bounds = array<i64: 32, 1>}, {pipeline_mode = #tpu.pipeline_mode<synchronous>, transform_indices = @transform_7, window_bounds = array<i64: 32, 32>}, {pipeline_mode = #tpu.pipeline_mode<synchronous>, transform_indices = @transform_8, window_bounds = array<i64: 32, 1>}, {pipeline_mode = #tpu.pipeline_mode<synchronous>, transform_indices = @transform_9, window_bounds = array<i64: 32, 32>}, {pipeline_mode = #tpu.pipeline_mode<synchronous>, transform_indices = @transform_10, window_bounds = array<i64: 32, 1>}, {pipeline_mode = #tpu.pipeline_mode<synchronous>, transform_indices = @transform_11, window_bounds = array<i64: 32, 32>}, {pipeline_mode = #tpu.pipeline_mode<synchronous>, transform_indices = @transform_12, window_bounds = array<i64: 32, 1>}, {pipeline_mode = #tpu.pipeline_mode<synchronous>, transform_indices = @transform_13, window_bounds = array<i64: 1, 32>}, {transform_indices = @transform_14, window_bounds = array<i64: 1, 128>}]} {
    %c0 = arith.constant 0 : index
    %c0_0 = arith.constant 0 : index
    %0 = vector.load %arg1[%c0, %c0_0] : memref<2x128xf32, #tpu.memory_space<vmem>>, vector<2x128xf32>
    %1 = vector.extract_strided_slice %0 {offsets = [0, 0], sizes = [1, 128], strides = [1, 1]} : vector<2x128xf32> to vector<1x128xf32>
    %2 = vector.extract_strided_slice %0 {offsets = [1, 0], sizes = [1, 128], strides = [1, 1]} : vector<2x128xf32> to vector<1x128xf32>
    %3 = tpu.iota {dimensions = array<i32: 0>} : vector<32x128xi32>
    %c0_i32 = arith.constant 0 : i32
    %4 = vector.broadcast %c0_i32 : i32 to vector<32x128xi32>
    %5 = arith.cmpi eq, %3, %4 : vector<32x128xi32>
    %c1_i32 = arith.constant 1 : i32
    %6 = vector.broadcast %c1_i32 : i32 to vector<32x128xi32>
    %7 = arith.cmpi eq, %3, %6 : vector<32x128xi32>
    %cst = arith.constant 0.000000e+00 : f32
    %8 = vector.shape_cast %2 : vector<1x128xf32> to vector<1x128xf32>
    %9 = vector.broadcast %8 : vector<1x128xf32> to vector<32x128xf32>
    %10 = vector.broadcast %cst : f32 to vector<32x128xf32>
    %11 = arith.select %7, %9, %10 : vector<32x128xi1>, vector<32x128xf32>
    %12 = vector.shape_cast %1 : vector<1x128xf32> to vector<1x128xf32>
    %13 = vector.broadcast %12 : vector<1x128xf32> to vector<32x128xf32>
    %14 = arith.select %5, %13, %11 : vector<32x128xi1>, vector<32x128xf32>
    %c0_1 = arith.constant 0 : index
    %c0_2 = arith.constant 0 : index
    %15 = vector.load %arg2[%c0_1, %c0_2] : memref<32x2xf32, #tpu.memory_space<vmem>>, vector<32x2xf32>
    %16 = vector.extract_strided_slice %15 {offsets = [0, 0], sizes = [32, 1], strides = [1, 1]} : vector<32x2xf32> to vector<32x1xf32>
    %17 = vector.broadcast %16 : vector<32x1xf32> to vector<32x128xf32>
    %18 = vector.broadcast %1 : vector<1x128xf32> to vector<32x128xf32>
    %19 = arith.mulf %17, %18 : vector<32x128xf32>
    %20 = vector.extract_strided_slice %15 {offsets = [0, 1], sizes = [32, 1], strides = [1, 1]} : vector<32x2xf32> to vector<32x1xf32>
    %21 = vector.broadcast %20 : vector<32x1xf32> to vector<32x128xf32>
    %22 = vector.broadcast %2 : vector<1x128xf32> to vector<32x128xf32>
    %23 = arith.mulf %21, %22 : vector<32x128xf32>
    %24 = arith.addf %19, %23 : vector<32x128xf32>
    %c0_3 = arith.constant 0 : index
    %c0_4 = arith.constant 0 : index
    %25 = vector.load %arg3[%c0_3, %c0_4] : memref<32x1xf32, #tpu.memory_space<vmem>>, vector<32x1xf32>
    %26 = vector.broadcast %25 : vector<32x1xf32> to vector<32x128xf32>
    %27 = arith.addf %24, %26 : vector<32x128xf32>
    %28 = math.absf %27 : vector<32x128xf32>
    %cst_5 = arith.constant 1.000000e+00 : f32
    %29 = vector.broadcast %cst_5 : f32 to vector<32x128xf32>
    %30 = arith.addf %27, %29 : vector<32x128xf32>
    %cst_6 = arith.constant 5.000000e-01 : f32
    %31 = vector.broadcast %cst_6 : f32 to vector<32x128xf32>
    %32 = arith.mulf %30, %31 : vector<32x128xf32>
    %33 = math.floor %32 : vector<32x128xf32>
    %cst_7 = arith.constant 2.000000e+00 : f32
    %34 = vector.broadcast %cst_7 : f32 to vector<32x128xf32>
    %35 = arith.mulf %34, %33 : vector<32x128xf32>
    %36 = arith.subf %27, %35 : vector<32x128xf32>
    %37 = math.absf %36 : vector<32x128xf32>
    %cst_8 = arith.constant 1.000000e+00 : f32
    %38 = vector.broadcast %cst_8 : f32 to vector<32x128xf32>
    %39 = arith.addf %38, %28 : vector<32x128xf32>
    %40 = tpu.reciprocal %39 {approx = true} : vector<32x128xf32> -> vector<32x128xf32>
    %41 = arith.mulf %39, %40 : vector<32x128xf32>
    %cst_9 = arith.constant 2.000000e+00 : f32
    %42 = vector.broadcast %cst_9 : f32 to vector<32x128xf32>
    %43 = arith.subf %42, %41 : vector<32x128xf32>
    %44 = arith.mulf %40, %43 : vector<32x128xf32>
    %45 = arith.mulf %27, %44 : vector<32x128xf32>
    %cst_10 = arith.constant 0.000000e+00 : f32
    %46 = vector.broadcast %cst_10 : f32 to vector<32x128xf32>
    %47 = arith.cmpf oge, %27, %46 : vector<32x128xf32>
    %48 = arith.select %47, %37, %45 : vector<32x128xi1>, vector<32x128xf32>
    %c0_11 = arith.constant 0 : index
    %c0_12 = arith.constant 0 : index
    %49 = vector.load %arg4[%c0_11, %c0_12] : memref<32x32xf32, #tpu.memory_space<vmem>>, vector<32x32xf32>
    %cst_13 = arith.constant dense<0.000000e+00> : vector<32x128xf32>
    %50 = tpu.matmul %49, %48, %cst_13 {dimension_numbers = #tpu.dot_dimension_numbers<[1], [0], [0], [1], [0, 0, 1, 1], [], []>} : vector<32x32xf32>, vector<32x128xf32>, vector<32x128xf32> -> vector<32x128xf32>
    %c0_14 = arith.constant 0 : index
    %c0_15 = arith.constant 0 : index
    %51 = vector.load %arg5[%c0_14, %c0_15] : memref<32x1xf32, #tpu.memory_space<vmem>>, vector<32x1xf32>
    %52 = vector.broadcast %51 : vector<32x1xf32> to vector<32x128xf32>
    %53 = arith.addf %50, %52 : vector<32x128xf32>
    %54 = math.absf %53 : vector<32x128xf32>
    %cst_16 = arith.constant 1.000000e+00 : f32
    %55 = vector.broadcast %cst_16 : f32 to vector<32x128xf32>
    %56 = arith.addf %53, %55 : vector<32x128xf32>
    %cst_17 = arith.constant 5.000000e-01 : f32
    %57 = vector.broadcast %cst_17 : f32 to vector<32x128xf32>
    %58 = arith.mulf %56, %57 : vector<32x128xf32>
    %59 = math.floor %58 : vector<32x128xf32>
    %cst_18 = arith.constant 2.000000e+00 : f32
    %60 = vector.broadcast %cst_18 : f32 to vector<32x128xf32>
    %61 = arith.mulf %60, %59 : vector<32x128xf32>
    %62 = arith.subf %53, %61 : vector<32x128xf32>
    %63 = math.absf %62 : vector<32x128xf32>
    %cst_19 = arith.constant 1.000000e+00 : f32
    %64 = vector.broadcast %cst_19 : f32 to vector<32x128xf32>
    %65 = arith.addf %64, %54 : vector<32x128xf32>
    %66 = tpu.reciprocal %65 {approx = true} : vector<32x128xf32> -> vector<32x128xf32>
    %67 = arith.mulf %65, %66 : vector<32x128xf32>
    %cst_20 = arith.constant 2.000000e+00 : f32
    %68 = vector.broadcast %cst_20 : f32 to vector<32x128xf32>
    %69 = arith.subf %68, %67 : vector<32x128xf32>
    %70 = arith.mulf %66, %69 : vector<32x128xf32>
    %71 = arith.mulf %53, %70 : vector<32x128xf32>
    %cst_21 = arith.constant 0.000000e+00 : f32
    %72 = vector.broadcast %cst_21 : f32 to vector<32x128xf32>
    %73 = arith.cmpf oge, %53, %72 : vector<32x128xf32>
    %74 = arith.select %73, %63, %71 : vector<32x128xi1>, vector<32x128xf32>
    %75 = arith.addf %74, %14 : vector<32x128xf32>
    %c0_22 = arith.constant 0 : index
    %c0_23 = arith.constant 0 : index
    %76 = vector.load %arg6[%c0_22, %c0_23] : memref<32x32xf32, #tpu.memory_space<vmem>>, vector<32x32xf32>
    %cst_24 = arith.constant dense<0.000000e+00> : vector<32x128xf32>
    %77 = tpu.matmul %76, %75, %cst_24 {dimension_numbers = #tpu.dot_dimension_numbers<[1], [0], [0], [1], [0, 0, 1, 1], [], []>} : vector<32x32xf32>, vector<32x128xf32>, vector<32x128xf32> -> vector<32x128xf32>
    %c0_25 = arith.constant 0 : index
    %c0_26 = arith.constant 0 : index
    %78 = vector.load %arg7[%c0_25, %c0_26] : memref<32x1xf32, #tpu.memory_space<vmem>>, vector<32x1xf32>
    %79 = vector.broadcast %78 : vector<32x1xf32> to vector<32x128xf32>
    %80 = arith.addf %77, %79 : vector<32x128xf32>
    %81 = math.absf %80 : vector<32x128xf32>
    %cst_27 = arith.constant 1.000000e+00 : f32
    %82 = vector.broadcast %cst_27 : f32 to vector<32x128xf32>
    %83 = arith.addf %80, %82 : vector<32x128xf32>
    %cst_28 = arith.constant 5.000000e-01 : f32
    %84 = vector.broadcast %cst_28 : f32 to vector<32x128xf32>
    %85 = arith.mulf %83, %84 : vector<32x128xf32>
    %86 = math.floor %85 : vector<32x128xf32>
    %cst_29 = arith.constant 2.000000e+00 : f32
    %87 = vector.broadcast %cst_29 : f32 to vector<32x128xf32>
    %88 = arith.mulf %87, %86 : vector<32x128xf32>
    %89 = arith.subf %80, %88 : vector<32x128xf32>
    %90 = math.absf %89 : vector<32x128xf32>
    %cst_30 = arith.constant 1.000000e+00 : f32
    %91 = vector.broadcast %cst_30 : f32 to vector<32x128xf32>
    %92 = arith.addf %91, %81 : vector<32x128xf32>
    %93 = tpu.reciprocal %92 {approx = true} : vector<32x128xf32> -> vector<32x128xf32>
    %94 = arith.mulf %92, %93 : vector<32x128xf32>
    %cst_31 = arith.constant 2.000000e+00 : f32
    %95 = vector.broadcast %cst_31 : f32 to vector<32x128xf32>
    %96 = arith.subf %95, %94 : vector<32x128xf32>
    %97 = arith.mulf %93, %96 : vector<32x128xf32>
    %98 = arith.mulf %80, %97 : vector<32x128xf32>
    %cst_32 = arith.constant 0.000000e+00 : f32
    %99 = vector.broadcast %cst_32 : f32 to vector<32x128xf32>
    %100 = arith.cmpf oge, %80, %99 : vector<32x128xf32>
    %101 = arith.select %100, %90, %98 : vector<32x128xi1>, vector<32x128xf32>
    %c0_33 = arith.constant 0 : index
    %c0_34 = arith.constant 0 : index
    %102 = vector.load %arg8[%c0_33, %c0_34] : memref<32x32xf32, #tpu.memory_space<vmem>>, vector<32x32xf32>
    %cst_35 = arith.constant dense<0.000000e+00> : vector<32x128xf32>
    %103 = tpu.matmul %102, %101, %cst_35 {dimension_numbers = #tpu.dot_dimension_numbers<[1], [0], [0], [1], [0, 0, 1, 1], [], []>} : vector<32x32xf32>, vector<32x128xf32>, vector<32x128xf32> -> vector<32x128xf32>
    %c0_36 = arith.constant 0 : index
    %c0_37 = arith.constant 0 : index
    %104 = vector.load %arg9[%c0_36, %c0_37] : memref<32x1xf32, #tpu.memory_space<vmem>>, vector<32x1xf32>
    %105 = vector.broadcast %104 : vector<32x1xf32> to vector<32x128xf32>
    %106 = arith.addf %103, %105 : vector<32x128xf32>
    %107 = math.absf %106 : vector<32x128xf32>
    %cst_38 = arith.constant 1.000000e+00 : f32
    %108 = vector.broadcast %cst_38 : f32 to vector<32x128xf32>
    %109 = arith.addf %106, %108 : vector<32x128xf32>
    %cst_39 = arith.constant 5.000000e-01 : f32
    %110 = vector.broadcast %cst_39 : f32 to vector<32x128xf32>
    %111 = arith.mulf %109, %110 : vector<32x128xf32>
    %112 = math.floor %111 : vector<32x128xf32>
    %cst_40 = arith.constant 2.000000e+00 : f32
    %113 = vector.broadcast %cst_40 : f32 to vector<32x128xf32>
    %114 = arith.mulf %113, %112 : vector<32x128xf32>
    %115 = arith.subf %106, %114 : vector<32x128xf32>
    %116 = math.absf %115 : vector<32x128xf32>
    %cst_41 = arith.constant 1.000000e+00 : f32
    %117 = vector.broadcast %cst_41 : f32 to vector<32x128xf32>
    %118 = arith.addf %117, %107 : vector<32x128xf32>
    %119 = tpu.reciprocal %118 {approx = true} : vector<32x128xf32> -> vector<32x128xf32>
    %120 = arith.mulf %118, %119 : vector<32x128xf32>
    %cst_42 = arith.constant 2.000000e+00 : f32
    %121 = vector.broadcast %cst_42 : f32 to vector<32x128xf32>
    %122 = arith.subf %121, %120 : vector<32x128xf32>
    %123 = arith.mulf %119, %122 : vector<32x128xf32>
    %124 = arith.mulf %106, %123 : vector<32x128xf32>
    %cst_43 = arith.constant 0.000000e+00 : f32
    %125 = vector.broadcast %cst_43 : f32 to vector<32x128xf32>
    %126 = arith.cmpf oge, %106, %125 : vector<32x128xf32>
    %127 = arith.select %126, %116, %124 : vector<32x128xi1>, vector<32x128xf32>
    %128 = arith.addf %127, %75 : vector<32x128xf32>
    %c0_44 = arith.constant 0 : index
    %c0_45 = arith.constant 0 : index
    %129 = vector.load %arg10[%c0_44, %c0_45] : memref<32x32xf32, #tpu.memory_space<vmem>>, vector<32x32xf32>
    %cst_46 = arith.constant dense<0.000000e+00> : vector<32x128xf32>
    %130 = tpu.matmul %129, %128, %cst_46 {dimension_numbers = #tpu.dot_dimension_numbers<[1], [0], [0], [1], [0, 0, 1, 1], [], []>} : vector<32x32xf32>, vector<32x128xf32>, vector<32x128xf32> -> vector<32x128xf32>
    %c0_47 = arith.constant 0 : index
    %c0_48 = arith.constant 0 : index
    %131 = vector.load %arg11[%c0_47, %c0_48] : memref<32x1xf32, #tpu.memory_space<vmem>>, vector<32x1xf32>
    %132 = vector.broadcast %131 : vector<32x1xf32> to vector<32x128xf32>
    %133 = arith.addf %130, %132 : vector<32x128xf32>
    %134 = math.absf %133 : vector<32x128xf32>
    %cst_49 = arith.constant 1.000000e+00 : f32
    %135 = vector.broadcast %cst_49 : f32 to vector<32x128xf32>
    %136 = arith.addf %133, %135 : vector<32x128xf32>
    %cst_50 = arith.constant 5.000000e-01 : f32
    %137 = vector.broadcast %cst_50 : f32 to vector<32x128xf32>
    %138 = arith.mulf %136, %137 : vector<32x128xf32>
    %139 = math.floor %138 : vector<32x128xf32>
    %cst_51 = arith.constant 2.000000e+00 : f32
    %140 = vector.broadcast %cst_51 : f32 to vector<32x128xf32>
    %141 = arith.mulf %140, %139 : vector<32x128xf32>
    %142 = arith.subf %133, %141 : vector<32x128xf32>
    %143 = math.absf %142 : vector<32x128xf32>
    %cst_52 = arith.constant 1.000000e+00 : f32
    %144 = vector.broadcast %cst_52 : f32 to vector<32x128xf32>
    %145 = arith.addf %144, %134 : vector<32x128xf32>
    %146 = tpu.reciprocal %145 {approx = true} : vector<32x128xf32> -> vector<32x128xf32>
    %147 = arith.mulf %145, %146 : vector<32x128xf32>
    %cst_53 = arith.constant 2.000000e+00 : f32
    %148 = vector.broadcast %cst_53 : f32 to vector<32x128xf32>
    %149 = arith.subf %148, %147 : vector<32x128xf32>
    %150 = arith.mulf %146, %149 : vector<32x128xf32>
    %151 = arith.mulf %133, %150 : vector<32x128xf32>
    %cst_54 = arith.constant 0.000000e+00 : f32
    %152 = vector.broadcast %cst_54 : f32 to vector<32x128xf32>
    %153 = arith.cmpf oge, %133, %152 : vector<32x128xf32>
    %154 = arith.select %153, %143, %151 : vector<32x128xi1>, vector<32x128xf32>
    %c0_55 = arith.constant 0 : index
    %c0_56 = arith.constant 0 : index
    %155 = vector.load %arg12[%c0_55, %c0_56] : memref<32x32xf32, #tpu.memory_space<vmem>>, vector<32x32xf32>
    %cst_57 = arith.constant dense<0.000000e+00> : vector<32x128xf32>
    %156 = tpu.matmul %155, %154, %cst_57 {dimension_numbers = #tpu.dot_dimension_numbers<[1], [0], [0], [1], [0, 0, 1, 1], [], []>} : vector<32x32xf32>, vector<32x128xf32>, vector<32x128xf32> -> vector<32x128xf32>
    %c0_58 = arith.constant 0 : index
    %c0_59 = arith.constant 0 : index
    %157 = vector.load %arg13[%c0_58, %c0_59] : memref<32x1xf32, #tpu.memory_space<vmem>>, vector<32x1xf32>
    %158 = vector.broadcast %157 : vector<32x1xf32> to vector<32x128xf32>
    %159 = arith.addf %156, %158 : vector<32x128xf32>
    %160 = math.absf %159 : vector<32x128xf32>
    %cst_60 = arith.constant 1.000000e+00 : f32
    %161 = vector.broadcast %cst_60 : f32 to vector<32x128xf32>
    %162 = arith.addf %159, %161 : vector<32x128xf32>
    %cst_61 = arith.constant 5.000000e-01 : f32
    %163 = vector.broadcast %cst_61 : f32 to vector<32x128xf32>
    %164 = arith.mulf %162, %163 : vector<32x128xf32>
    %165 = math.floor %164 : vector<32x128xf32>
    %cst_62 = arith.constant 2.000000e+00 : f32
    %166 = vector.broadcast %cst_62 : f32 to vector<32x128xf32>
    %167 = arith.mulf %166, %165 : vector<32x128xf32>
    %168 = arith.subf %159, %167 : vector<32x128xf32>
    %169 = math.absf %168 : vector<32x128xf32>
    %cst_63 = arith.constant 1.000000e+00 : f32
    %170 = vector.broadcast %cst_63 : f32 to vector<32x128xf32>
    %171 = arith.addf %170, %160 : vector<32x128xf32>
    %172 = tpu.reciprocal %171 {approx = true} : vector<32x128xf32> -> vector<32x128xf32>
    %173 = arith.mulf %171, %172 : vector<32x128xf32>
    %cst_64 = arith.constant 2.000000e+00 : f32
    %174 = vector.broadcast %cst_64 : f32 to vector<32x128xf32>
    %175 = arith.subf %174, %173 : vector<32x128xf32>
    %176 = arith.mulf %172, %175 : vector<32x128xf32>
    %177 = arith.mulf %159, %176 : vector<32x128xf32>
    %cst_65 = arith.constant 0.000000e+00 : f32
    %178 = vector.broadcast %cst_65 : f32 to vector<32x128xf32>
    %179 = arith.cmpf oge, %159, %178 : vector<32x128xf32>
    %180 = arith.select %179, %169, %177 : vector<32x128xi1>, vector<32x128xf32>
    %181 = arith.addf %180, %128 : vector<32x128xf32>
    %c0_66 = arith.constant 0 : index
    %c0_67 = arith.constant 0 : index
    %182 = vector.load %arg14[%c0_66, %c0_67] : memref<1x32xf32, #tpu.memory_space<vmem>>, vector<1x32xf32>
    %cst_68 = arith.constant dense<0.000000e+00> : vector<1x128xf32>
    %183 = tpu.matmul %182, %181, %cst_68 {dimension_numbers = #tpu.dot_dimension_numbers<[1], [0], [0], [1], [0, 0, 1, 1], [], []>} : vector<1x32xf32>, vector<32x128xf32>, vector<1x128xf32> -> vector<1x128xf32>
    %c0_69 = arith.constant 0 : index
    %c0_70 = arith.constant 0 : index
    %184 = vector.load %arg15[%c0_69, %c0_70] : memref<1x128xf32, #tpu.memory_space<vmem>>, vector<1x128xf32>
    tpu.vector_store %arg15[%c0_69, %c0_70], %183 {strides = array<i32>} : memref<1x128xf32, #tpu.memory_space<vmem>>, vector<1x128xf32>,
    return
  }
  func.func @transform_0(%arg0: i32) -> (i32, i32) {
    %c0_i32 = arith.constant 0 : i32
    %c0_i32_0 = arith.constant 0 : i32
    return %c0_i32, %arg0 : i32, i32
  }
  func.func @transform_1(%arg0: i32) -> (i32, i32) {
    %c0_i32 = arith.constant 0 : i32
    %c0_i32_0 = arith.constant 0 : i32
    %c0_i32_1 = arith.constant 0 : i32
    return %c0_i32, %c0_i32_0 : i32, i32
  }
  func.func @transform_2(%arg0: i32) -> (i32, i32) {
    %c0_i32 = arith.constant 0 : i32
    %c0_i32_0 = arith.constant 0 : i32
    %c0_i32_1 = arith.constant 0 : i32
    return %c0_i32, %c0_i32_0 : i32, i32
  }
  func.func @transform_3(%arg0: i32) -> (i32, i32) {
    %c0_i32 = arith.constant 0 : i32
    %c0_i32_0 = arith.constant 0 : i32
    %c0_i32_1 = arith.constant 0 : i32
    return %c0_i32, %c0_i32_0 : i32, i32
  }
  func.func @transform_4(%arg0: i32) -> (i32, i32) {
    %c0_i32 = arith.constant 0 : i32
    %c0_i32_0 = arith.constant 0 : i32
    %c0_i32_1 = arith.constant 0 : i32
    return %c0_i32, %c0_i32_0 : i32, i32
  }
  func.func @transform_5(%arg0: i32) -> (i32, i32) {
    %c0_i32 = arith.constant 0 : i32
    %c0_i32_0 = arith.constant 0 : i32
    %c0_i32_1 = arith.constant 0 : i32
    return %c0_i32, %c0_i32_0 : i32, i32
  }
  func.func @transform_6(%arg0: i32) -> (i32, i32) {
    %c0_i32 = arith.constant 0 : i32
    %c0_i32_0 = arith.constant 0 : i32
    %c0_i32_1 = arith.constant 0 : i32
    return %c0_i32, %c0_i32_0 : i32, i32
  }
  func.func @transform_7(%arg0: i32) -> (i32, i32) {
    %c0_i32 = arith.constant 0 : i32
    %c0_i32_0 = arith.constant 0 : i32
    %c0_i32_1 = arith.constant 0 : i32
    return %c0_i32, %c0_i32_0 : i32, i32
  }
  func.func @transform_8(%arg0: i32) -> (i32, i32) {
    %c0_i32 = arith.constant 0 : i32
    %c0_i32_0 = arith.constant 0 : i32
    %c0_i32_1 = arith.constant 0 : i32
    return %c0_i32, %c0_i32_0 : i32, i32
  }
  func.func @transform_9(%arg0: i32) -> (i32, i32) {
    %c0_i32 = arith.constant 0 : i32
    %c0_i32_0 = arith.constant 0 : i32
    %c0_i32_1 = arith.constant 0 : i32
    return %c0_i32, %c0_i32_0 : i32, i32
  }
  func.func @transform_10(%arg0: i32) -> (i32, i32) {
    %c0_i32 = arith.constant 0 : i32
    %c0_i32_0 = arith.constant 0 : i32
    %c0_i32_1 = arith.constant 0 : i32
    return %c0_i32, %c0_i32_0 : i32, i32
  }
  func.func @transform_11(%arg0: i32) -> (i32, i32) {
    %c0_i32 = arith.constant 0 : i32
    %c0_i32_0 = arith.constant 0 : i32
    %c0_i32_1 = arith.constant 0 : i32
    return %c0_i32, %c0_i32_0 : i32, i32
  }
  func.func @transform_12(%arg0: i32) -> (i32, i32) {
    %c0_i32 = arith.constant 0 : i32
    %c0_i32_0 = arith.constant 0 : i32
    %c0_i32_1 = arith.constant 0 : i32
    return %c0_i32, %c0_i32_0 : i32, i32
  }
  func.func @transform_13(%arg0: i32) -> (i32, i32) {
    %c0_i32 = arith.constant 0 : i32
    %c0_i32_0 = arith.constant 0 : i32
    %c0_i32_1 = arith.constant 0 : i32
    return %c0_i32, %c0_i32_0 : i32, i32
  }
  func.func @transform_14(%arg0: i32) -> (i32, i32) {
    %c0_i32 = arith.constant 0 : i32
    %c0_i32_0 = arith.constant 0 : i32
    return %c0_i32, %arg0 : i32, i32
  }
}

</mosaic_0001>

<bundles_post_ra>
// kernel: resnet_st_forward.1
= control target key start
LH: loop header
LB: loop body
LE: loop exit
PB: predicated region body
PF: predicated region fallthrough
CT: control target
= control target key end

     0   :  { %v1440_v0 = vmov 1   ;;  %v1441_v1 = vmov 0   ;;  %vm245_vm0 = vcmask 261120   ;;  %v48_v31 = vlaneseq  ;;  %s1842_s1 = inlined_call_operand.vmem [shape: f32[32,2], index: 1, kind: input, shape index: {}]   ;;  %s1843_s2 = inlined_call_operand.vmem [shape: f32[32,1], index: 2, kind: input, shape index: {}]   ;;  %s1844_s4 = inlined_call_operand.vmem [shape: f32[32,1], index: 4, kind: input, shape index: {}]   ;;  %s1845_s6 = inlined_call_operand.vmem [shape: f32[32,1], index: 6, kind: input, shape index: {}]   ;;  %s1846_s8 = inlined_call_operand.vmem [shape: f32[32,1], index: 8, kind: input, shape index: {}]   ;;  %s1847_s10 = inlined_call_operand.vmem [shape: f32[32,1], index: 10, kind: input, shape index: {}]   ;;  %s1848_s12 = inlined_call_operand.vmem [shape: f32[32,1], index: 12, kind: input, shape index: {}]   ;;  %s1849_s3 = inlined_call_operand.vmem [shape: f32[32,32], index: 3, kind: input, shape index: {}]   ;;  %s1850_s0 = inlined_call_operand.vmem [shape: f32[2,128], index: 0, kind: input, shape index: {}]   ;;  %s1851_s5 = inlined_call_operand.vmem [shape: f32[32,32], index: 5, kind: input, shape index: {}]   ;;  %s1852_s7 = inlined_call_operand.vmem [shape: f32[32,32], index: 7, kind: input, shape index: {}]   ;;  %s1853_s9 = inlined_call_operand.vmem [shape: f32[32,32], index: 9, kind: input, shape index: {}]   ;;  %s1854_s11 = inlined_call_operand.vmem [shape: f32[32,32], index: 11, kind: input, shape index: {}]   ;;  %s1855_s13 = inlined_call_operand.vmem [shape: f32[1,32], index: 13, kind: input, shape index: {}]   ;;  %s1856_s14 = inlined_call_operand.vmem [shape: f32[1,128], index: 14, kind: output, shape index: {}]  }
   0x1   :  { %1385 = vset.pattern.permute.xlu0 %v1440_v0  ;;  %1386 = vset.pattern.permute.xlu1 %v1441_v1  ;;  %v80_v2 = vld [vmem:[%s1842_s1 + $0x18] sm:$0xff]  ;;  %v79_v3 = vld [vmem:[%s1842_s1 + $0x10] sm:$0xff]  ;;  %v78_v4 = vld [vmem:[%s1842_s1 + $0x8] sm:$0xff] }
   0x2   :  { %118 = vperm.xlu0 %1385, %v80_v2   ;;  %93 = vperm.xlu1 %1386, %v79_v3   ;;  %v77_v5 = vld [vmem:[%s1842_s1] sm:$0xff]  ;;  %v132_v6 = vld [vmem:[%s1843_s2 + $0x18] sm:$0xff]  ;;  %v130_v7 = vld [vmem:[%s1843_s2 + $0x8] sm:$0xff]  ;;  %v1607_v32 = vshrl.u32 %v48_v31, 7 }
   0x3   :  { %v224_v8 = vld [vmem:[%s1844_s4 + $0x18] sm:$0xff]  ;;  %v131_v9 = vld [vmem:[%s1843_s2 + $0x10] sm:$0xff]  ;;  %v221_v10 = vld [vmem:[%s1844_s4] sm:$0xff] }
   0x4   :  { %v129_v11 = vld [vmem:[%s1843_s2] sm:$0xff]  ;;  %v414_v12 = vld [vmem:[%s1845_s6 + $0x18] sm:$0xff]  ;;  %v223_v13 = vld [vmem:[%s1844_s4 + $0x10] sm:$0xff]  ;;  %v63_v35 = vsub.s32 1, %v1607_v32  ;;  %v71_v36 = vsub.s32 0, %v1607_v32  ;;  %vm57_vm5 = vcmp.eq.s32.totalorder %v1607_v32, 1 }
   0x5   :  { %v412_v14 = vld [vmem:[%s1845_s6 + $0x8] sm:$0xff]  ;;  %v599_v16 = vld [vmem:[%s1846_s8 + $0x18] sm:$0xff]  ;;  %v413_v17 = vld [vmem:[%s1845_s6 + $0x10] sm:$0xff]  ;;  %vm53_vm7 = vcmp.eq.s32.totalorder %v1607_v32, 0 }
   0x6   :  { %1387 = vset.pattern.permute.xlu1 %v1440_v0  ;;  %110 = vperm.xlu0 %1385, %v78_v4   ;;  %v222_v15 = vld [vmem:[%s1844_s4 + $0x8] sm:$0xff]  ;;  %v411_v19 = vld [vmem:[%s1845_s6] sm:$0xff]  ;;  %v788_v20 = vld [vmem:[%s1847_s10 + $0x18] sm:$0xff] }
   0x7   :  { %114 = vperm.xlu1 %1387, %v79_v3   ;;  %v597_v18 = vld [vmem:[%s1846_s8 + $0x8] sm:$0xff]  ;;  %v598_v21 = vld [vmem:[%s1846_s8 + $0x10] sm:$0xff]  ;;  %v596_v23 = vld [vmem:[%s1846_s8] sm:$0xff] }
   0x8   :  { %v786_v22 = vld [vmem:[%s1847_s10 + $0x8] sm:$0xff]  ;;  %v973_v24 = vld [vmem:[%s1848_s12 + $0x18] sm:$0xff]  ;;  %v787_v25 = vld [vmem:[%s1847_s10 + $0x10] sm:$0xff] }
   0x9   :  { %v971_v26 = vld [vmem:[%s1848_s12 + $0x8] sm:$0xff]  ;;  %v217_v27 = vld [vmem:[%s1849_s3] sm:$0xff]  ;;  %v972_v29 = vld [vmem:[%s1848_s12 + $0x10] sm:$0xff] }
   0xa   :  { %1389 = vset.pattern.permute.xlu0 %v1441_v1  ;;  %1308 = vmatprep.mubr.msk.f32.mxu0 %vm245_vm0, %v217_v27  ;;  %v785_v28 = vld [vmem:[%s1847_s10] sm:$0xff] }
   0xb   :  { %1388 = vset.pattern.permute.xlu1 %v1441_v1  ;;  %98 = vperm.xlu0 %1389, %v80_v2   ;;  %v970_v30 = vld [vmem:[%s1848_s12] sm:$0xff] }
   0xc   :  { %88 = vperm.xlu1 %1388, %v78_v4   ;;  %v47_v38 = vld [vmem:[%s1850_s0] sm:$0x3] }
   0xd   :  { %v1614_v40 = vrot.slane %v47_v38, %v63_v35  ;;  %v1616_v41 = vrot.slane %v47_v38, %v71_v36 }
   0xf   :  { %83 = vperm.xlu0 %1389, %v77_v5  }
  0x10   :  { %150 = vperm.xlu1 %1388, %v132_v6  }
  0x13   :  { %140 = vperm.xlu0 %1389, %v130_v7  }
  0x14   :  { %1390 = vset.pattern.permute.xlu1 %v1440_v0 }
  0x15   :  { %106 = vperm.xlu1 %1390, %v77_v5  }
  0x17   :  { %242 = vperm.xlu0 %1389, %v224_v8  }
  0x19   :  { %1391 = vset.pattern.permute.xlu1 %v1441_v1 }
  0x1a   :  { %145 = vperm.xlu1 %1391, %v131_v9  }
  0x1b   :  { %227 = vperm.xlu0 %1389, %v221_v10  }
  0x1e   :  { %135 = vperm.xlu1 %1391, %v129_v11  }
  0x1f   :  { %432 = vperm.xlu0 %1389, %v414_v12  }
  0x22   :  { %237 = vperm.xlu1 %1391, %v223_v13  }
  0x23   :  { %422 = vperm.xlu0 %1389, %v412_v14  }
  0x26   :  { %232 = vperm.xlu1 %1391, %v222_v15  }
  0x27   :  { %617 = vperm.xlu0 %1389, %v599_v16  }
  0x2a   :  { %427 = vperm.xlu1 %1391, %v413_v17  }
  0x2b   :  { %607 = vperm.xlu0 %1389, %v597_v18  }
  0x2e   :  { %417 = vperm.xlu1 %1391, %v411_v19  }
  0x2f   :  { %806 = vperm.xlu0 %1389, %v788_v20  }
  0x32   :  { %612 = vperm.xlu1 %1391, %v598_v21  }
  0x33   :  { %796 = vperm.xlu0 %1389, %v786_v22  }
  0x36   :  { %602 = vperm.xlu1 %1391, %v596_v23  }
  0x37   :  { %991 = vperm.xlu0 %1389, %v973_v24  }
  0x3a   :  { %801 = vperm.xlu1 %1391, %v787_v25  }
  0x3b   :  { %981 = vperm.xlu0 %1389, %v971_v26  }
  0x3e   :  { %791 = vperm.xlu1 %1391, %v785_v28  }
  0x42   :  { %986 = vperm.xlu1 %1391, %v972_v29  }
  0x46   :  { %976 = vperm.xlu1 %1391, %v970_v30  }
  0x7d   :  { %v94_v33 = vpop.permute.xlu1 %93  ;;  %v119_v34 = vpop.permute.xlu0 %118 }
  0x7e   :  { %v124_v42 = vmul.f32 %v119_v34, %v1614_v40  ;;  %v103_v60 = vmul.f32 %v94_v33, %v1616_v41 }
  0x81   :  { %v111_v37 = vpop.permute.xlu0 %110 }
  0x82   :  { %v115_v39 = vpop.permute.xlu1 %114  ;;  %v122_v46 = vmul.f32 %v111_v37, %v1614_v40 }
  0x83   :  { %v123_v56 = vmul.f32 %v115_v39, %v1614_v40 }
  0x85   :  { %v127_v1 = vadd.f32 %v123_v56, %v103_v60 }
  0x86   :  { %v99_v43 = vpop.permute.xlu0 %98 }
  0x87   :  { %v104_v44 = vmul.f32 %v99_v43, %v1616_v41  ;;  %v89_v45 = vpop.permute.xlu1 %88 }
  0x88   :  { %v102_v47 = vmul.f32 %v89_v45, %v1616_v41 }
  0x89   :  { %v128_v48 = vadd.f32 %v124_v42, %v104_v44 }
  0x8a   :  { %v84_v49 = vpop.permute.xlu0 %83  ;;  %v126_v52 = vadd.f32 %v122_v46, %v102_v47 }
  0x8b   :  { %v151_v50 = vpop.permute.xlu1 %150  ;;  %v101_v63 = vmul.f32 %v84_v49, %v1616_v41 }
  0x8c   :  { %v156_v51 = vadd.f32 %v151_v50, %v128_v48 }
  0x8e   :  { %v141_v53 = vpop.permute.xlu0 %140  ;;  %v160_v54 = vand.u32 2147483647, %v156_v51  ;;  %v164_v61 = vadd.f32 1.0, %v156_v51  ;;  %vm212_vm1 = vcmp.ge.f32.partialorder %v156_v51, 0.0 }
  0x8f   :  { %v1622_v55 = vadd.f32 %v141_v53, %v126_v52 }
  0x90   :  { %v107_v57 = vpop.permute.xlu1 %106  ;;  %v188_v58 = vadd.f32 1.0, %v160_v54  ;;  %v168_v4 = vmul.f32 0.5, %v164_v61 }
  0x91   :  { %v158_v59 = vand.u32 2147483647, %v1622_v55  ;;  %v121_v0 = vmul.f32 %v107_v57, %v1614_v40  ;;  %v162_v14 = vadd.f32 1.0, %v1622_v55  ;;  %vm210_vm3 = vcmp.ge.f32.partialorder %v1622_v55, 0.0 }
  0x92   :  { %1392 = vrcp.f32 %v188_v58  ;;  %v172_v9 = vfloor.f32 %v168_v4 }
  0x93   :  { %v186_v62 = vadd.f32 1.0, %v158_v59  ;;  %v125_v6 = vadd.f32 %v121_v0, %v101_v63  ;;  %v166_v23 = vmul.f32 0.5, %v162_v14  ;;  %v219_v63 = vld [vmem:[%s1849_s3 + $0x10] sm:$0xff]  ;;  %v407_v0 = vld [vmem:[%s1851_s5] sm:$0xff] }
  0x94   :  { %v176_v13 = vmul.f32 2.0, %v172_v9  ;;  %1322 = vmatprep.mubr.msk.f32.mxu1 %vm245_vm0, %v407_v0 }
  0x95   :  { %v146_v2 = vpop.permute.xlu1 %145  ;;  %1394 = vrcp.f32 %v186_v62  ;;  %v170_v30 = vfloor.f32 %v166_v23 }
  0x96   :  { %v155_v3 = vadd.f32 %v146_v2, %v127_v1  ;;  %v180_v21 = vsub.f32 %v156_v51, %v176_v13  ;;  %v243_v2 = vpop.permute.xlu0 %242 }
  0x97   :  { %v174_v38 = vmul.f32 2.0, %v170_v30 }
  0x98   :  { %v159_v5 = vand.u32 2147483647, %v155_v3  ;;  %v163_v11 = vadd.f32 1.0, %v155_v3  ;;  %v184_v28 = vand.u32 2147483647, %v180_v21  ;;  %vm211_vm2 = vcmp.ge.f32.partialorder %v155_v3, 0.0 }
  0x99   :  { %v136_v7 = vpop.permute.xlu1 %135  ;;  %v178_v47 = vsub.f32 %v1622_v55, %v174_v38 }
  0x9a   :  { %v1629_v8 = vadd.f32 %v136_v7, %v125_v6  ;;  %v187_v10 = vadd.f32 1.0, %v159_v5  ;;  %v167_v17 = vmul.f32 0.5, %v163_v11  ;;  %v228_v6 = vpop.permute.xlu0 %227 }
  0x9b   :  { %v182_v56 = vand.u32 2147483647, %v178_v47 }
  0x9c   :  { %v157_v12 = vand.u32 2147483647, %v1629_v8  ;;  %1396 = vrcp.f32 %v187_v10  ;;  %v161_v19 = vadd.f32 1.0, %v1629_v8  ;;  %v171_v24 = vfloor.f32 %v167_v17 }
  0x9d   :  { %vm209_vm4 = vcmp.ge.f32.partialorder %v1629_v8, 0.0  ;;  %v238_v1 = vpop.permute.xlu1 %237 }
  0x9e   :  { %v185_v15 = vadd.f32 1.0, %v157_v12  ;;  %v165_v27 = vmul.f32 0.5, %v161_v19  ;;  %v175_v31 = vmul.f32 2.0, %v171_v24 }
  0x9f   :  { %v1393_v16 = vpop.eup %1392 }
  0xa0   :  { %v196_v18 = vmul.f32 %v1393_v16, %v188_v58  ;;  %1398 = vrcp.f32 %v185_v15  ;;  %v169_v35 = vfloor.f32 %v165_v27  ;;  %v179_v39 = vsub.f32 %v155_v3, %v175_v31 }
  0xa2   :  { %v1395_v20 = vpop.eup %1394  ;;  %v200_v22 = vsub.f32 2.0, %v196_v18  ;;  %v173_v44 = vmul.f32 2.0, %v169_v35  ;;  %v183_v49 = vand.u32 2147483647, %v179_v39 }
  0xa3   :  { %v194_v26 = vmul.f32 %v1395_v20, %v186_v62  ;;  %v218_v62 = vld [vmem:[%s1849_s3 + $0x8] sm:$0xff] }
  0xa4   :  { %v204_v25 = vmul.f32 %v1393_v16, %v200_v22  ;;  %v177_v52 = vsub.f32 %v1629_v8, %v173_v44 }
  0xa5   :  { %v198_v34 = vsub.f32 2.0, %v194_v26 }
  0xa6   :  { %v208_v29 = vmul.f32 %v204_v25, %v156_v51  ;;  %v181_v59 = vand.u32 2147483647, %v177_v52 }
  0xa7   :  { %v202_v43 = vmul.f32 %v1395_v20, %v198_v34 }
  0xa8   :  { %v216_v33 = vsel %vm212_vm1, %v184_v28, %v208_v29 }
  0xa9   :  { %v1397_v36 = vpop.eup %1396  ;;  %1300 = vmatprep.subr.mxu0 %v216_v33  ;;  %v206_v51 = vmul.f32 %v202_v43, %v1622_v55  ;;  %v220_v55 = vld [vmem:[%s1849_s3 + $0x18] sm:$0xff] }
  0xaa   :  { %1301 = vmatpush3.msra.mxu0 %v216_v33  ;;  %v195_v37 = vmul.f32 %v1397_v36, %v187_v10 }
  0xab   :  { %v214_v58 = vsel %vm210_vm3, %v182_v56, %v206_v51 }
  0xac   :  { %v199_v42 = vsub.f32 2.0, %v195_v37 }
  0xad   :  { %v1399_v45 = vpop.eup %1398 }
  0xae   :  { %v203_v46 = vmul.f32 %v1397_v36, %v199_v42  ;;  %v193_v48 = vmul.f32 %v1399_v45, %v185_v15 }
  0xb0   :  { %v207_v50 = vmul.f32 %v203_v46, %v155_v3  ;;  %v197_v53 = vsub.f32 2.0, %v193_v48  ;;  %v233_v3 = vpop.permute.xlu1 %232 }
  0xb2   :  { %v215_v54 = vsel %vm211_vm2, %v183_v49, %v207_v50  ;;  %v201_v57 = vmul.f32 %v1399_v45, %v197_v53 }
  0xb3   :  { %1302 = vmatprep.subr.mxu0 %v215_v54 }
  0xb4   :  { %1303 = vmatpush3.msra.mxu0 %v215_v54  ;;  %v205_v60 = vmul.f32 %v201_v57, %v1629_v8 }
  0xb5   :  { %1304 = vmatprep.subr.mxu0 %v214_v58 }
  0xb6   :  { %1305 = vmatpush3.msra.mxu0 %v214_v58  ;;  %v213_v61 = vsel %vm209_vm4, %v181_v59, %v205_v60 }
  0xb7   :  { %1306 = vmatprep.subr.mxu0 %v213_v61 }
  0xb8   :  { %1307 = vmatpush3.msra.mxu0 %v213_v61 }
  0xb9   :  { %1309 = vmatmul.mubr.msk.f32.vlgmr.msra.gmra.mxu0 %vm245_vm0, %v218_v62 }
  0xba   :  { %1311 = vmatprep.mubr.msk.f32.mxu0 %vm245_vm0, %v219_v63 }
  0xbd   :  { %1312 = vmatmul.mubr.msk.f32.gmra.mxu0 %vm245_vm0, %v220_v55  ;;  %v65_v55 = vsel %vm57_vm5, %v1614_v40, 0.0 }
  0xbe   :  { %v73_v32 = vsel %vm53_vm7, %v1616_v41, %v65_v55  ;;  %v409_v41 = vld [vmem:[%s1851_s5 + $0x10] sm:$0xff] }
 0x179   :  { %v1310_v4 = vpop.f32.mrf.mxu0 }
 0x17a   :  { %v1656_v5 = vadd.f32 %v1310_v4, %v233_v3 }
 0x17b   :  { %v324_v7 = vpop.f32.mrf.mxu0 }
 0x17c   :  { %v344_v8 = vand.u32 2147483647, %v1656_v5  ;;  %v1659_v9 = vadd.f32 %v324_v7, %v228_v6  ;;  %v348_v24 = vadd.f32 1.0, %v1656_v5  ;;  %vm396_vm10 = vcmp.ge.f32.partialorder %v1656_v5, 0.0 }
 0x17d   :  { %v1313_v10 = vpop.f32.mrf.mxu0 }
 0x17e   :  { %v343_v11 = vand.u32 2147483647, %v1659_v9  ;;  %v340_v12 = vadd.f32 %v1313_v10, %v243_v2  ;;  %v372_v14 = vadd.f32 1.0, %v344_v8  ;;  %v347_v22 = vadd.f32 1.0, %v1659_v9 }
 0x17f   :  { %v334_v13 = vpop.f32.mrf.mxu0  ;;  %v352_v28 = vmul.f32 0.5, %v348_v24  ;;  %vm395_vm9 = vcmp.ge.f32.partialorder %v1659_v9, 0.0 }
 0x180   :  { %v371_v15 = vadd.f32 1.0, %v343_v11  ;;  %v346_v16 = vand.u32 2147483647, %v340_v12  ;;  %v335_v17 = vadd.f32 %v334_v13, %v238_v1  ;;  %1400 = vrcp.f32 %v372_v14  ;;  %v592_v11 = vld [vmem:[%s1852_s7] sm:$0xff]  ;;  %v428_v13 = vpop.permute.xlu1 %427 }
 0x181   :  { %v350_v20 = vadd.f32 1.0, %v340_v12  ;;  %v351_v26 = vmul.f32 0.5, %v347_v22  ;;  %v356_v35 = vfloor.f32 %v352_v28  ;;  %vm398_vm6 = vcmp.ge.f32.partialorder %v340_v12, 0.0  ;;  %1336 = vmatprep.mubr.msk.f32.mxu0 %vm245_vm0, %v592_v11 }
 0x182   :  { %1402 = vrcp.f32 %v371_v15  ;;  %v345_v18 = vand.u32 2147483647, %v335_v17  ;;  %v374_v19 = vadd.f32 1.0, %v346_v16  ;;  %v349_v23 = vadd.f32 1.0, %v335_v17 }
 0x183   :  { %v354_v25 = vmul.f32 0.5, %v350_v20  ;;  %v355_v30 = vfloor.f32 %v351_v26  ;;  %v360_v48 = vmul.f32 2.0, %v356_v35  ;;  %vm397_vm8 = vcmp.ge.f32.partialorder %v335_v17, 0.0 }
 0x184   :  { %1404 = vrcp.f32 %v374_v19  ;;  %v373_v21 = vadd.f32 1.0, %v345_v18  ;;  %v353_v27 = vmul.f32 0.5, %v349_v23 }
 0x185   :  { %v358_v29 = vfloor.f32 %v354_v25  ;;  %v359_v42 = vmul.f32 2.0, %v355_v30  ;;  %v364_v59 = vsub.f32 %v1656_v5, %v360_v48 }
 0x186   :  { %1406 = vrcp.f32 %v373_v21  ;;  %v357_v33 = vfloor.f32 %v353_v27 }
 0x187   :  { %v362_v37 = vmul.f32 2.0, %v358_v29  ;;  %v363_v53 = vsub.f32 %v1659_v9, %v359_v42  ;;  %v368_v7 = vand.u32 2147483647, %v364_v59 }
 0x188   :  { %v361_v44 = vmul.f32 2.0, %v357_v33 }
 0x189   :  { %v366_v49 = vsub.f32 %v340_v12, %v362_v37  ;;  %v367_v0 = vand.u32 2147483647, %v363_v53 }
 0x18a   :  { %v365_v56 = vsub.f32 %v335_v17, %v361_v44 }
 0x18b   :  { %v370_v60 = vand.u32 2147483647, %v366_v49 }
 0x18c   :  { %v369_v2 = vand.u32 2147483647, %v365_v56 }
 0x18d   :  { %v1401_v31 = vpop.eup %1400 }
 0x18e   :  { %v380_v36 = vmul.f32 %v1401_v31, %v372_v14 }
 0x18f   :  { %v1403_v34 = vpop.eup %1402 }
 0x190   :  { %v379_v38 = vmul.f32 %v1403_v34, %v371_v15  ;;  %v384_v45 = vsub.f32 2.0, %v380_v36 }
 0x191   :  { %v1405_v39 = vpop.eup %1404 }
 0x192   :  { %v382_v43 = vmul.f32 %v1405_v39, %v374_v19  ;;  %v383_v46 = vsub.f32 2.0, %v379_v38  ;;  %v388_v58 = vmul.f32 %v1401_v31, %v384_v45 }
 0x193   :  { %v1407_v47 = vpop.eup %1406 }
 0x194   :  { %v386_v50 = vsub.f32 2.0, %v382_v43  ;;  %v381_v51 = vmul.f32 %v1407_v47, %v373_v21  ;;  %v387_v52 = vmul.f32 %v1403_v34, %v383_v46  ;;  %v392_v4 = vmul.f32 %v388_v58, %v1656_v5  ;;  %v410_v5 = vld [vmem:[%s1851_s5 + $0x18] sm:$0xff] }
 0x196   :  { %v390_v54 = vmul.f32 %v1405_v39, %v386_v50  ;;  %v385_v57 = vsub.f32 2.0, %v381_v51  ;;  %v391_v63 = vmul.f32 %v387_v52, %v1659_v9  ;;  %v1682_v8 = vsel %vm396_vm10, %v368_v7, %v392_v4  ;;  %v408_v9 = vld [vmem:[%s1851_s5 + $0x8] sm:$0xff] }
 0x198   :  { %v394_v61 = vmul.f32 %v390_v54, %v340_v12  ;;  %v389_v62 = vmul.f32 %v1407_v47, %v385_v57  ;;  %v399_v40 = vsel %vm395_vm9, %v367_v0, %v391_v63  ;;  %v433_v12 = vpop.permute.xlu0 %432 }
 0x199   :  { %v1685_v10 = vadd.f32 %v399_v40, %v73_v32 }
 0x19a   :  { %v1670_v1 = vsel %vm398_vm6, %v370_v60, %v394_v61  ;;  %v393_v3 = vmul.f32 %v389_v62, %v335_v17  ;;  %v418_v17 = vpop.permute.xlu1 %417 }
 0x19b   :  { %1314 = vmatprep.subr.mxu1 %v1670_v1 }
 0x19c   :  { %1315 = vmatpush3.msra.mxu1 %v1670_v1  ;;  %v1676_v6 = vsel %vm397_vm8, %v369_v2, %v393_v3  ;;  %v423_v14 = vpop.permute.xlu0 %422  ;;  %vm1443_vm8 = vmmov 0  }
 0x19d   :  { %1316 = vmatprep.subr.mxu1 %v1676_v6 }
 0x19e   :  { %1317 = vmatpush3.msra.mxu1 %v1676_v6 }
 0x19f   :  { %1318 = vmatprep.subr.mxu1 %v1682_v8 }
 0x1a0   :  { %1319 = vmatpush3.msra.mxu1 %v1682_v8 }
 0x1a1   :  { %1320 = vmatprep.subr.mxu1 %v1685_v10 }
 0x1a2   :  { %1321 = vmatpush3.msra.mxu1 %v1685_v10 }
 0x1a3   :  { %1323 = vmatmul.mubr.msk.f32.vlgmr.msra.gmra.mxu1 %vm245_vm0, %v408_v9 }
 0x1a4   :  { %1325 = vmatprep.mubr.msk.f32.mxu1 %vm245_vm0, %v409_v41 }
 0x1a7   :  { %1326 = vmatmul.mubr.msk.f32.gmra.mxu1 %vm245_vm0, %v410_v5 }
 0x263   :  { %v1324_v15 = vpop.f32.mrf.mxu1 }
 0x264   :  { %v1706_v16 = vadd.f32 %v1324_v15, %v423_v14 }
 0x265   :  { %v513_v18 = vpop.f32.mrf.mxu1 }
 0x266   :  { %v533_v19 = vand.u32 2147483647, %v1706_v16  ;;  %v1709_v20 = vadd.f32 %v513_v18, %v418_v17  ;;  %v537_v35 = vadd.f32 1.0, %v1706_v16  ;;  %vm585_vm13 = vcmp.ge.f32.partialorder %v1706_v16, 0.0 }
 0x267   :  { %v1327_v21 = vpop.f32.mrf.mxu1 }
 0x268   :  { %v532_v22 = vand.u32 2147483647, %v1709_v20  ;;  %v529_v23 = vadd.f32 %v1327_v21, %v433_v12  ;;  %v561_v24 = vadd.f32 1.0, %v533_v19  ;;  %v536_v37 = vadd.f32 1.0, %v1709_v20 }
 0x269   :  { %v523_v25 = vpop.f32.mrf.mxu1  ;;  %v541_v39 = vmul.f32 0.5, %v537_v35  ;;  %vm584_vm14 = vcmp.ge.f32.partialorder %v1709_v20, 0.0 }
 0x26a   :  { %v535_v26 = vand.u32 2147483647, %v529_v23  ;;  %v524_v27 = vadd.f32 %v523_v25, %v428_v13  ;;  %1408 = vrcp.f32 %v561_v24  ;;  %v560_v28 = vadd.f32 1.0, %v532_v22  ;;  %v593_v22 = vld [vmem:[%s1852_s7 + $0x8] sm:$0xff]  ;;  %v613_v25 = vpop.permute.xlu1 %612 }
 0x26b   :  { %v539_v31 = vadd.f32 1.0, %v529_v23  ;;  %v540_v43 = vmul.f32 0.5, %v536_v37  ;;  %v545_v46 = vfloor.f32 %v541_v39  ;;  %vm587_vm11 = vcmp.ge.f32.partialorder %v529_v23, 0.0 }
 0x26c   :  { %v534_v29 = vand.u32 2147483647, %v524_v27  ;;  %v563_v30 = vadd.f32 1.0, %v535_v26  ;;  %1410 = vrcp.f32 %v560_v28  ;;  %v538_v34 = vadd.f32 1.0, %v524_v27 }
 0x26d   :  { %v543_v36 = vmul.f32 0.5, %v539_v31  ;;  %v544_v51 = vfloor.f32 %v540_v43  ;;  %v549_v58 = vmul.f32 2.0, %v545_v46  ;;  %vm586_vm12 = vcmp.ge.f32.partialorder %v524_v27, 0.0 }
 0x26e   :  { %1412 = vrcp.f32 %v563_v30  ;;  %v562_v33 = vadd.f32 1.0, %v534_v29  ;;  %v542_v38 = vmul.f32 0.5, %v538_v34  ;;  %v603_v29 = vpop.permute.xlu1 %602 }
 0x26f   :  { %v547_v42 = vfloor.f32 %v543_v36  ;;  %v548_v63 = vmul.f32 2.0, %v544_v51  ;;  %v553_v4 = vsub.f32 %v1706_v16, %v549_v58 }
 0x270   :  { %1414 = vrcp.f32 %v562_v33  ;;  %v546_v45 = vfloor.f32 %v542_v38 }
 0x271   :  { %v551_v49 = vmul.f32 2.0, %v547_v42  ;;  %v552_v41 = vsub.f32 %v1709_v20, %v548_v63  ;;  %v557_v15 = vand.u32 2147483647, %v553_v4 }
 0x272   :  { %v550_v54 = vmul.f32 2.0, %v546_v45 }
 0x273   :  { %v555_v59 = vsub.f32 %v529_v23, %v551_v49  ;;  %v556_v19 = vand.u32 2147483647, %v552_v41 }
 0x274   :  { %v554_v0 = vsub.f32 %v524_v27, %v550_v54 }
 0x275   :  { %v559_v7 = vand.u32 2147483647, %v555_v59 }
 0x276   :  { %v558_v11 = vand.u32 2147483647, %v554_v0 }
 0x277   :  { %v1409_v44 = vpop.eup %1408 }
 0x278   :  { %v569_v47 = vmul.f32 %v1409_v44, %v561_v24  ;;  %v618_v24 = vpop.permute.xlu0 %617 }
 0x279   :  { %v1411_v48 = vpop.eup %1410 }
 0x27a   :  { %v568_v52 = vmul.f32 %v1411_v48, %v560_v28  ;;  %v573_v56 = vsub.f32 2.0, %v569_v47 }
 0x27b   :  { %v1413_v50 = vpop.eup %1412 }
 0x27c   :  { %v571_v53 = vmul.f32 %v1413_v50, %v563_v30  ;;  %v572_v62 = vsub.f32 2.0, %v568_v52  ;;  %v577_v3 = vmul.f32 %v1409_v44, %v573_v56  ;;  %v608_v26 = vpop.permute.xlu0 %607 }
 0x27d   :  { %v1415_v57 = vpop.eup %1414 }
 0x27e   :  { %v575_v60 = vsub.f32 2.0, %v571_v53  ;;  %v570_v61 = vmul.f32 %v1415_v57, %v562_v33  ;;  %v576_v9 = vmul.f32 %v1411_v48, %v572_v62  ;;  %v581_v13 = vmul.f32 %v577_v3, %v1706_v16  ;;  %v595_v16 = vld [vmem:[%s1852_s7 + $0x18] sm:$0xff] }
 0x280   :  { %v579_v55 = vmul.f32 %v1413_v50, %v575_v60  ;;  %v574_v2 = vsub.f32 2.0, %v570_v61  ;;  %v580_v17 = vmul.f32 %v576_v9, %v1709_v20  ;;  %v589_v18 = vsel %vm585_vm13, %v557_v15, %v581_v13  ;;  %v781_v20 = vld [vmem:[%s1853_s9] sm:$0xff] }
 0x281   :  { %1350 = vmatprep.mubr.msk.f32.mxu1 %vm245_vm0, %v781_v20 }
 0x282   :  { %v583_v32 = vmul.f32 %v579_v55, %v529_v23  ;;  %v578_v40 = vmul.f32 %v1415_v57, %v574_v2  ;;  %v588_v21 = vsel %vm584_vm14, %v556_v19, %v580_v17  ;;  %v594_v23 = vld [vmem:[%s1852_s7 + $0x10] sm:$0xff] }
 0x284   :  { %v591_v5 = vsel %vm587_vm11, %v559_v7, %v583_v32  ;;  %v582_v12 = vmul.f32 %v578_v40, %v524_v27 }
 0x285   :  { %1328 = vmatprep.subr.mxu0 %v591_v5 }
 0x286   :  { %1329 = vmatpush3.msra.mxu0 %v591_v5  ;;  %v590_v14 = vsel %vm586_vm12, %v558_v11, %v582_v12 }
 0x287   :  { %1330 = vmatprep.subr.mxu0 %v590_v14 }
 0x288   :  { %1331 = vmatpush3.msra.mxu0 %v590_v14 }
 0x289   :  { %1332 = vmatprep.subr.mxu0 %v589_v18 }
 0x28a   :  { %1333 = vmatpush3.msra.mxu0 %v589_v18 }
 0x28b   :  { %1334 = vmatprep.subr.mxu0 %v588_v21 }
 0x28c   :  { %1335 = vmatpush3.msra.mxu0 %v588_v21 }
 0x28d   :  { %1337 = vmatmul.mubr.msk.f32.vlgmr.msra.gmra.mxu0 %vm245_vm0, %v593_v22 }
 0x28e   :  { %1339 = vmatprep.mubr.msk.f32.mxu0 %vm245_vm0, %v594_v23 }
 0x291   :  { %1340 = vmatmul.mubr.msk.f32.gmra.mxu0 %vm245_vm0, %v595_v16 }
 0x34d   :  { %v1338_v27 = vpop.f32.mrf.mxu0 }
 0x34e   :  { %v1736_v28 = vadd.f32 %v1338_v27, %v608_v26 }
 0x34f   :  { %v698_v30 = vpop.f32.mrf.mxu0 }
 0x350   :  { %v718_v31 = vand.u32 2147483647, %v1736_v28  ;;  %v1739_v33 = vadd.f32 %v698_v30, %v603_v29  ;;  %v722_v48 = vadd.f32 1.0, %v1736_v28  ;;  %vm770_vm2 = vcmp.ge.f32.partialorder %v1736_v28, 0.0 }
 0x351   :  { %v1341_v34 = vpop.f32.mrf.mxu0 }
 0x352   :  { %v746_v35 = vadd.f32 1.0, %v718_v31  ;;  %v717_v36 = vand.u32 2147483647, %v1739_v33  ;;  %v714_v37 = vadd.f32 %v1341_v34, %v618_v24  ;;  %v721_v51 = vadd.f32 1.0, %v1739_v33 }
 0x353   :  { %v708_v38 = vpop.f32.mrf.mxu0  ;;  %v726_v52 = vmul.f32 0.5, %v722_v48  ;;  %vm769_vm3 = vcmp.ge.f32.partialorder %v1739_v33, 0.0 }
 0x354   :  { %1416 = vrcp.f32 %v746_v35  ;;  %v745_v39 = vadd.f32 1.0, %v717_v36  ;;  %v720_v42 = vand.u32 2147483647, %v714_v37  ;;  %v709_v43 = vadd.f32 %v708_v38, %v613_v25  ;;  %v802_v38 = vpop.permute.xlu1 %801 }
 0x355   :  { %v724_v46 = vadd.f32 1.0, %v714_v37  ;;  %v725_v57 = vmul.f32 0.5, %v721_v51  ;;  %v730_v58 = vfloor.f32 %v726_v52  ;;  %vm772_vm15 = vcmp.ge.f32.partialorder %v714_v37, 0.0 }
 0x356   :  { %1418 = vrcp.f32 %v745_v39  ;;  %v748_v44 = vadd.f32 1.0, %v720_v42  ;;  %v719_v45 = vand.u32 2147483647, %v709_v43  ;;  %v723_v49 = vadd.f32 1.0, %v709_v43 }
 0x357   :  { %v728_v50 = vmul.f32 0.5, %v724_v46  ;;  %v729_v2 = vfloor.f32 %v725_v57  ;;  %v734_v4 = vmul.f32 2.0, %v730_v58  ;;  %vm771_vm1 = vcmp.ge.f32.partialorder %v709_v43, 0.0 }
 0x358   :  { %1420 = vrcp.f32 %v748_v44  ;;  %v747_v47 = vadd.f32 1.0, %v719_v45  ;;  %v727_v53 = vmul.f32 0.5, %v723_v49 }
 0x359   :  { %v732_v54 = vfloor.f32 %v728_v50  ;;  %v733_v12 = vmul.f32 2.0, %v729_v2  ;;  %v738_v14 = vsub.f32 %v1736_v28, %v734_v4 }
 0x35a   :  { %1422 = vrcp.f32 %v747_v47  ;;  %v731_v61 = vfloor.f32 %v727_v53 }
 0x35b   :  { %v736_v62 = vmul.f32 2.0, %v732_v54  ;;  %v737_v16 = vsub.f32 %v1739_v33, %v733_v12  ;;  %v742_v24 = vand.u32 2147483647, %v738_v14 }
 0x35c   :  { %v735_v7 = vmul.f32 2.0, %v731_v61 }
 0x35d   :  { %v740_v9 = vsub.f32 %v714_v37, %v736_v62  ;;  %v741_v34 = vand.u32 2147483647, %v737_v16 }
 0x35e   :  { %v739_v15 = vsub.f32 %v709_v43, %v735_v7 }
 0x35f   :  { %v744_v19 = vand.u32 2147483647, %v740_v9 }
 0x360   :  { %v743_v26 = vand.u32 2147483647, %v739_v15 }
 0x361   :  { %v1417_v56 = vpop.eup %1416 }
 0x362   :  { %v754_v59 = vmul.f32 %v1417_v56, %v746_v35 }
 0x363   :  { %v1419_v60 = vpop.eup %1418 }
 0x364   :  { %v753_v63 = vmul.f32 %v1419_v60, %v745_v39  ;;  %v758_v0 = vsub.f32 2.0, %v754_v59 }
 0x365   :  { %v1421_v55 = vpop.eup %1420 }
 0x366   :  { %v756_v3 = vmul.f32 %v1421_v55, %v748_v44  ;;  %v757_v32 = vsub.f32 2.0, %v753_v63  ;;  %v762_v11 = vmul.f32 %v1417_v56, %v758_v0  ;;  %v792_v44 = vpop.permute.xlu1 %791 }
 0x367   :  { %v1423_v40 = vpop.eup %1422 }
 0x368   :  { %v760_v41 = vsub.f32 2.0, %v756_v3  ;;  %v755_v5 = vmul.f32 %v1423_v40, %v747_v47  ;;  %v761_v18 = vmul.f32 %v1419_v60, %v757_v32  ;;  %v766_v23 = vmul.f32 %v762_v11, %v1736_v28 }
 0x36a   :  { %v764_v13 = vmul.f32 %v1421_v55, %v760_v41  ;;  %v759_v17 = vsub.f32 2.0, %v755_v5  ;;  %v765_v29 = vmul.f32 %v761_v18, %v1739_v33  ;;  %v774_v31 = vsel %vm770_vm2, %v742_v24, %v766_v23  ;;  %v966_v33 = vld [vmem:[%s1854_s11] sm:$0xff] }
 0x36b   :  { %v1760_v36 = vadd.f32 %v774_v31, %v1682_v8  ;;  %v783_v8 = vld [vmem:[%s1853_s9 + $0x10] sm:$0xff]  ;;  %1364 = vmatprep.mubr.msk.f32.mxu0 %vm245_vm0, %v966_v33 }
 0x36c   :  { %v768_v21 = vmul.f32 %v764_v13, %v714_v37  ;;  %v763_v22 = vmul.f32 %v1423_v40, %v759_v17  ;;  %v807_v37 = vpop.permute.xlu0 %806 }
 0x36e   :  { %v776_v20 = vsel %vm772_vm15, %v744_v19, %v768_v21  ;;  %v767_v27 = vmul.f32 %v763_v22, %v709_v43 }
 0x36f   :  { %v1748_v25 = vadd.f32 %v776_v20, %v1670_v1  ;;  %v773_v1 = vsel %vm769_vm3, %v741_v34, %v765_v29 }
 0x370   :  { %v775_v30 = vsel %vm771_vm1, %v743_v26, %v767_v27  ;;  %v1765_v28 = vadd.f32 %v773_v1, %v1685_v10  ;;  %v784_v10 = vld [vmem:[%s1853_s9 + $0x18] sm:$0xff]  ;;  %v797_v39 = vpop.permute.xlu0 %796 }
 0x371   :  { %1342 = vmatprep.subr.mxu1 %v1748_v25  ;;  %v1755_v35 = vadd.f32 %v775_v30, %v1676_v6  ;;  %v782_v6 = vld [vmem:[%s1853_s9 + $0x8] sm:$0xff] }
 0x372   :  { %1343 = vmatpush3.msra.mxu1 %v1748_v25 }
 0x373   :  { %1344 = vmatprep.subr.mxu1 %v1755_v35 }
 0x374   :  { %1345 = vmatpush3.msra.mxu1 %v1755_v35 }
 0x375   :  { %1346 = vmatprep.subr.mxu1 %v1760_v36 }
 0x376   :  { %1347 = vmatpush3.msra.mxu1 %v1760_v36 }
 0x377   :  { %1348 = vmatprep.subr.mxu1 %v1765_v28 }
 0x378   :  { %1349 = vmatpush3.msra.mxu1 %v1765_v28 }
 0x379   :  { %1351 = vmatmul.mubr.msk.f32.vlgmr.msra.gmra.mxu1 %vm245_vm0, %v782_v6 }
 0x37a   :  { %1353 = vmatprep.mubr.msk.f32.mxu1 %vm245_vm0, %v783_v8 }
 0x37d   :  { %1354 = vmatmul.mubr.msk.f32.gmra.mxu1 %vm245_vm0, %v784_v10 }
 0x439   :  { %v1352_v42 = vpop.f32.mrf.mxu1 }
 0x43a   :  { %v1786_v43 = vadd.f32 %v1352_v42, %v797_v39 }
 0x43b   :  { %v887_v45 = vpop.f32.mrf.mxu1 }
 0x43c   :  { %v907_v46 = vand.u32 2147483647, %v1786_v43  ;;  %v1789_v47 = vadd.f32 %v887_v45, %v792_v44  ;;  %v911_v62 = vadd.f32 1.0, %v1786_v43  ;;  %vm959_vm6 = vcmp.ge.f32.partialorder %v1786_v43, 0.0 }
 0x43d   :  { %v1355_v48 = vpop.f32.mrf.mxu1 }
 0x43e   :  { %v906_v49 = vand.u32 2147483647, %v1789_v47  ;;  %v903_v50 = vadd.f32 %v1355_v48, %v807_v37  ;;  %v935_v51 = vadd.f32 1.0, %v907_v46  ;;  %v910_v55 = vadd.f32 1.0, %v1789_v47 }
 0x43f   :  { %v897_v52 = vpop.f32.mrf.mxu1  ;;  %v915_v2 = vmul.f32 0.5, %v911_v62  ;;  %vm958_vm7 = vcmp.ge.f32.partialorder %v1789_v47, 0.0 }
 0x440   :  { %v909_v53 = vand.u32 2147483647, %v903_v50  ;;  %v898_v54 = vadd.f32 %v897_v52, %v802_v38  ;;  %1424 = vrcp.f32 %v935_v51  ;;  %v934_v56 = vadd.f32 1.0, %v906_v49  ;;  %v967_v49 = vld [vmem:[%s1854_s11 + $0x8] sm:$0xff]  ;;  %v987_v52 = vpop.permute.xlu1 %986 }
 0x441   :  { %v913_v59 = vadd.f32 1.0, %v903_v50  ;;  %v914_v4 = vmul.f32 0.5, %v910_v55  ;;  %v919_v40 = vfloor.f32 %v915_v2  ;;  %vm961_vm4 = vcmp.ge.f32.partialorder %v903_v50, 0.0 }
 0x442   :  { %v908_v57 = vand.u32 2147483647, %v898_v54  ;;  %v937_v58 = vadd.f32 1.0, %v909_v53  ;;  %1426 = vrcp.f32 %v934_v56  ;;  %v912_v61 = vadd.f32 1.0, %v898_v54 }
 0x443   :  { %v917_v63 = vmul.f32 0.5, %v913_v59  ;;  %v918_v12 = vfloor.f32 %v914_v4  ;;  %v923_v19 = vmul.f32 2.0, %v919_v40  ;;  %vm960_vm5 = vcmp.ge.f32.partialorder %v898_v54, 0.0 }
 0x444   :  { %1428 = vrcp.f32 %v937_v58  ;;  %v936_v60 = vadd.f32 1.0, %v908_v57  ;;  %v916_v0 = vmul.f32 0.5, %v912_v61  ;;  %v977_v57 = vpop.permute.xlu1 %976 }
 0x445   :  { %v921_v3 = vfloor.f32 %v917_v63  ;;  %v922_v20 = vmul.f32 2.0, %v918_v12  ;;  %v927_v30 = vsub.f32 %v1786_v43, %v923_v19 }
 0x446   :  { %1430 = vrcp.f32 %v936_v60  ;;  %v920_v32 = vfloor.f32 %v916_v0 }
 0x447   :  { %v925_v5 = vmul.f32 2.0, %v921_v3  ;;  %v926_v8 = vsub.f32 %v1789_v47, %v922_v20  ;;  %v931_v42 = vand.u32 2147483647, %v927_v30 }
 0x448   :  { %v924_v15 = vmul.f32 2.0, %v920_v32 }
 0x449   :  { %v929_v21 = vsub.f32 %v903_v50, %v925_v5  ;;  %v930_v46 = vand.u32 2147483647, %v926_v8 }
 0x44a   :  { %v928_v26 = vsub.f32 %v898_v54, %v924_v15 }
 0x44b   :  { %v933_v31 = vand.u32 2147483647, %v929_v21 }
 0x44c   :  { %v932_v33 = vand.u32 2147483647, %v928_v26 }
 0x44d   :  { %v1425_v7 = vpop.eup %1424 }
 0x44e   :  { %v943_v9 = vmul.f32 %v1425_v7, %v935_v51  ;;  %v992_v51 = vpop.permute.xlu0 %991 }
 0x44f   :  { %v1427_v41 = vpop.eup %1426 }
 0x450   :  { %v942_v13 = vmul.f32 %v1427_v41, %v934_v56  ;;  %v947_v17 = vsub.f32 2.0, %v943_v9 }
 0x451   :  { %v1429_v11 = vpop.eup %1428 }
 0x452   :  { %v945_v14 = vmul.f32 %v1429_v11, %v937_v58  ;;  %v946_v16 = vsub.f32 2.0, %v942_v13  ;;  %v951_v29 = vmul.f32 %v1425_v7, %v947_v17  ;;  %v982_v53 = vpop.permute.xlu0 %981 }
 0x453   :  { %v1431_v18 = vpop.eup %1430 }
 0x454   :  { %v949_v22 = vsub.f32 2.0, %v945_v14  ;;  %v944_v23 = vmul.f32 %v1431_v18, %v936_v60  ;;  %v950_v6 = vmul.f32 %v1427_v41, %v946_v16  ;;  %v955_v38 = vmul.f32 %v951_v29, %v1786_v43  ;;  %v969_v43 = vld [vmem:[%s1854_s11 + $0x18] sm:$0xff] }
 0x456   :  { %v953_v24 = vmul.f32 %v1429_v11, %v949_v22  ;;  %v948_v27 = vsub.f32 2.0, %v944_v23  ;;  %v954_v44 = vmul.f32 %v950_v6, %v1789_v47  ;;  %v963_v45 = vsel %vm959_vm6, %v931_v42, %v955_v38 }
 0x457   :  { %v1442_v47 = vmov 0.0  }
 0x458   :  { %v957_v34 = vmul.f32 %v953_v24, %v903_v50  ;;  %v952_v1 = vmul.f32 %v1431_v18, %v948_v27  ;;  %v962_v48 = vsel %vm958_vm7, %v930_v46, %v954_v44  ;;  %v968_v50 = vld [vmem:[%s1854_s11 + $0x10] sm:$0xff]  ;;  %1370 = vmatprep.subr.mxu1 %v1442_v47  ;;  %1378 = vmatprep.mubr.msk.f32.mxu1 %vm1443_vm8, %v1442_v47 }
 0x45a   :  { %v965_v10 = vsel %vm961_vm4, %v933_v31, %v957_v34  ;;  %v956_v37 = vmul.f32 %v952_v1, %v898_v54 }
 0x45b   :  { %1356 = vmatprep.subr.mxu0 %v965_v10 }
 0x45c   :  { %1357 = vmatpush3.msra.mxu0 %v965_v10  ;;  %v964_v39 = vsel %vm960_vm5, %v932_v33, %v956_v37 }
 0x45d   :  { %1358 = vmatprep.subr.mxu0 %v964_v39 }
 0x45e   :  { %1359 = vmatpush3.msra.mxu0 %v964_v39 }
 0x45f   :  { %1360 = vmatprep.subr.mxu0 %v963_v45 }
 0x460   :  { %1361 = vmatpush3.msra.mxu0 %v963_v45 }
 0x461   :  { %1362 = vmatprep.subr.mxu0 %v962_v48 }
 0x462   :  { %1363 = vmatpush3.msra.mxu0 %v962_v48 }
 0x463   :  { %1365 = vmatmul.mubr.msk.f32.vlgmr.msra.gmra.mxu0 %vm245_vm0, %v967_v49 }
 0x464   :  { %1367 = vmatprep.mubr.msk.f32.mxu0 %vm245_vm0, %v968_v50 }
 0x467   :  { %1368 = vmatmul.mubr.msk.f32.gmra.mxu0 %vm245_vm0, %v969_v43 }
 0x523   :  { %v1366_v54 = vpop.f32.mrf.mxu0 }
 0x524   :  { %v1814_v56 = vadd.f32 %v1366_v54, %v982_v53 }
 0x525   :  { %v1072_v58 = vpop.f32.mrf.mxu0 }
 0x526   :  { %v1092_v59 = vand.u32 2147483647, %v1814_v56  ;;  %v1817_v60 = vadd.f32 %v1072_v58, %v977_v57  ;;  %v1096_v41 = vadd.f32 1.0, %v1814_v56  ;;  %vm1144_vm11 = vcmp.ge.f32.partialorder %v1814_v56, 0.0 }
 0x527   :  { %v1369_v61 = vpop.f32.mrf.mxu0 }
 0x528   :  { %v1120_v62 = vadd.f32 1.0, %v1092_v59  ;;  %v1091_v63 = vand.u32 2147483647, %v1817_v60  ;;  %v1088_v55 = vadd.f32 %v1369_v61, %v992_v51  ;;  %v1095_v11 = vadd.f32 1.0, %v1817_v60 }
 0x529   :  { %v1082_v0 = vpop.f32.mrf.mxu0  ;;  %v1100_v13 = vmul.f32 0.5, %v1096_v41  ;;  %vm1143_vm12 = vcmp.ge.f32.partialorder %v1817_v60, 0.0 }
 0x52a   :  { %1432 = vrcp.f32 %v1120_v62  ;;  %v1119_v2 = vadd.f32 1.0, %v1091_v63  ;;  %v1094_v3 = vand.u32 2147483647, %v1088_v55  ;;  %v1083_v4 = vadd.f32 %v1082_v0, %v987_v52 }
 0x52b   :  { %v1098_v40 = vadd.f32 1.0, %v1088_v55  ;;  %v1099_v15 = vmul.f32 0.5, %v1095_v11  ;;  %v1104_v19 = vfloor.f32 %v1100_v13  ;;  %vm1146_vm9 = vcmp.ge.f32.partialorder %v1088_v55, 0.0 }
 0x52c   :  { %1434 = vrcp.f32 %v1119_v2  ;;  %v1122_v7 = vadd.f32 1.0, %v1094_v3  ;;  %v1093_v32 = vand.u32 2147483647, %v1083_v4  ;;  %v1097_v5 = vadd.f32 1.0, %v1083_v4 }
 0x52d   :  { %v1102_v12 = vmul.f32 0.5, %v1098_v40  ;;  %v1103_v16 = vfloor.f32 %v1099_v15  ;;  %v1108_v29 = vmul.f32 2.0, %v1104_v19  ;;  %vm1145_vm10 = vcmp.ge.f32.partialorder %v1083_v4, 0.0 }
 0x52e   :  { %1436 = vrcp.f32 %v1122_v7  ;;  %v1121_v9 = vadd.f32 1.0, %v1093_v32  ;;  %v1101_v14 = vmul.f32 0.5, %v1097_v5 }
 0x52f   :  { %v1106_v18 = vfloor.f32 %v1102_v12  ;;  %v1107_v6 = vmul.f32 2.0, %v1103_v16  ;;  %v1112_v38 = vsub.f32 %v1814_v56, %v1108_v29 }
 0x530   :  { %1438 = vrcp.f32 %v1121_v9  ;;  %v1105_v23 = vfloor.f32 %v1101_v14 }
 0x531   :  { %v1110_v26 = vmul.f32 2.0, %v1106_v18  ;;  %v1111_v46 = vsub.f32 %v1817_v60, %v1107_v6  ;;  %v1116_v51 = vand.u32 2147483647, %v1112_v38 }
 0x532   :  { %v1109_v34 = vmul.f32 2.0, %v1105_v23 }
 0x533   :  { %v1114_v8 = vsub.f32 %v1088_v55, %v1110_v26 }
 0x534   :  { %v1113_v39 = vsub.f32 %v1083_v4, %v1109_v34 }
 0x535   :  { %v1118_v48 = vand.u32 2147483647, %v1114_v8 }
 0x536   :  { %v1117_v53 = vand.u32 2147483647, %v1113_v39 }
 0x537   :  { %v1433_v17 = vpop.eup %1432 }
 0x538   :  { %v1128_v21 = vmul.f32 %v1433_v17, %v1120_v62  ;;  %v1115_v62 = vand.u32 2147483647, %v1111_v46 }
 0x539   :  { %v1435_v22 = vpop.eup %1434 }
 0x53a   :  { %v1127_v20 = vmul.f32 %v1435_v22, %v1119_v2  ;;  %v1132_v24 = vsub.f32 2.0, %v1128_v21 }
 0x53b   :  { %v1437_v27 = vpop.eup %1436 }
 0x53c   :  { %v1131_v30 = vsub.f32 2.0, %v1127_v20  ;;  %v1130_v31 = vmul.f32 %v1437_v27, %v1122_v7  ;;  %v1136_v37 = vmul.f32 %v1433_v17, %v1132_v24 }
 0x53d   :  { %v1439_v1 = vpop.eup %1438 }
 0x53e   :  { %v1134_v10 = vsub.f32 2.0, %v1130_v31  ;;  %v1129_v33 = vmul.f32 %v1439_v1, %v1121_v9  ;;  %v1135_v45 = vmul.f32 %v1435_v22, %v1131_v30  ;;  %v1140_v43 = vmul.f32 %v1136_v37, %v1814_v56  ;;  %v1155_v56 = vld [vmem:[%s1855_s13] sm:$0x1] }
 0x540   :  { %v1133_v42 = vsub.f32 2.0, %v1129_v33  ;;  %v1138_v44 = vmul.f32 %v1437_v27, %v1134_v10  ;;  %v1139_v57 = vmul.f32 %v1135_v45, %v1817_v60  ;;  %v1148_v61 = vsel %vm1144_vm11, %v1116_v51, %v1140_v43 }
 0x541   :  { %v1152_v0 = vadd.f32 %v1148_v61, %v1760_v36 }
 0x542   :  { %v1142_v49 = vmul.f32 %v1138_v44, %v1088_v55  ;;  %v1137_v50 = vmul.f32 %v1439_v1, %v1133_v42  ;;  %v1147_v55 = vsel %vm1143_vm12, %v1115_v62, %v1139_v57 }
 0x544   :  { %v1150_v52 = vsel %vm1146_vm9, %v1118_v48, %v1142_v49  ;;  %v1141_v54 = vmul.f32 %v1137_v50, %v1083_v4 }
 0x545   :  { %v1154_v58 = vadd.f32 %v1150_v52, %v1748_v25  ;;  %v1151_v25 = vadd.f32 %v1147_v55, %v1765_v28 }
 0x546   :  { %v1149_v59 = vsel %vm1145_vm10, %v1117_v53, %v1141_v54 }
 0x547   :  { %1371 = vmatpush3.msra.mxu1 %v1154_v58  ;;  %v1153_v63 = vadd.f32 %v1149_v59, %v1755_v35 }
 0x548   :  { %1372 = vmatprep.subr.mxu1 %v1442_v47 }
 0x549   :  { %1373 = vmatpush3.msra.mxu1 %v1153_v63 }
 0x54a   :  { %1374 = vmatprep.subr.mxu1 %v1442_v47 }
 0x54b   :  { %1375 = vmatpush3.msra.mxu1 %v1152_v0 }
 0x54c   :  { %1376 = vmatprep.subr.mxu1 %v1442_v47 }
 0x54d   :  { %1377 = vmatpush3.msra.mxu1 %v1151_v25 }
 0x54e   :  { %1379 = vmatmul.mubr.msk.f32.vlgmr.msra.gmra.mxu1 %vm245_vm0, %v1155_v56 }
 0x60e   :  { %v1225_v35 = vpop.f32.mrf.mxu1 }
 0x60f   :  { %1229 = vst [vmem:[%s1856_s14] sm:$0x1] %v1225_v35 }
 0x610   :  { %v1380_v36 = vpop.f32.mrf.mxu1 }

</bundles_post_ra>
